<compile_context>
chip_gen: v6e
topology: v6e:2x2x1
jax: 0.10.0
libtpu: 0.0.40
codegen_flags: <defaults>
</compile_context>

<pallas_src>
import functools

import jax
import jax.numpy as jnp
from jax.experimental import pallas as pl
from jax.experimental.pallas import tpu as pltpu

EPS = 1e-5    # nn.BatchNorm1d default eps
LANE = 128    # TPU lane width


def _round_up(n, m):
    return ((n + m - 1) // m) * m


# ----------------------------------------------------------------------------
# Fused kernel: conv (single big matmul) + BN1 + ReLU [+ BN2 + ReLU epilogue]
# ----------------------------------------------------------------------------
def _make_up_kernel(use_bn, fuse_up):
    """Kernel for one conv layer of Up.

    Ref order: x, w, [bias if not use_bn], [g1, b1 if use_bn],
               [g2, b2 if fuse_up], o1, [o2 if fuse_up]
    Per grid step j over output-channel tiles of width TN:
        x  : (B, L + K - 1, Ci)  bf16  (Ci % 128 == 0; same block for every j)
        w  : (K * Ci, TN)        bf16
        o1 : (B, L, TN)          bf16 (intermediate layer) / f32 (last layer)
        o2 : (B, L, TN)          f32   ReLU(BN2(h)) -- 2x-repeated outside
    """
    def kernel(*refs):
        it = iter(refs)
        x_ref = next(it)
        w_ref = next(it)
        bias_ref = None if use_bn else next(it)
        if use_bn:
            g1_ref, b1_ref = next(it), next(it)
        if fuse_up:
            g2_ref, b2_ref = next(it), next(it)
        o1_ref = next(it)
        o2_ref = next(it) if fuse_up else None

        B, _, Ci = x_ref.shape
        K = w_ref.shape[0] // Ci
        L = o1_ref.shape[1]
        inv_n = 1.0 / float(B * L)

        # ---- conv as ONE MXU matmul: (B*L, K*Ci) @ (K*Ci, TN), f32 accumulate.
        # Taps concatenated along lanes (Ci is a 128 multiple -> aligned concat),
        # batches stacked along rows.  B, K are small & static: unrolled.
        per_batch = []
        for b in range(B):
            taps = [x_ref[b, pl.ds(t, L), :] for t in range(K)]
            per_batch.append(taps[0] if K == 1 else jnp.concatenate(taps, axis=-1))
        lhs = per_batch[0] if B == 1 else jnp.concatenate(per_batch, axis=0)
        acc = jnp.dot(lhs, w_ref[...], preferred_element_type=jnp.float32)  # (B*L, TN)

        # ---- BN1 (training-mode batch stats, one pass) / bias, then ReLU ----
        if use_bn:
            mean = jnp.sum(acc, axis=0, keepdims=True) * inv_n          # (1, TN)
            ex2 = jnp.sum(acc * acc, axis=0, keepdims=True) * inv_n
            var = jnp.maximum(ex2 - mean * mean, 0.0)
            scale = jax.lax.rsqrt(var + EPS) * g1_ref[...]
            shift = b1_ref[...] - mean * scale
            h = jnp.maximum(acc * scale + shift, 0.0)                   # (B*L, TN)
        else:
            h = jnp.maximum(acc + bias_ref[...], 0.0)

        for b in range(B):
            o1_ref[b, :, :] = h[b * L:(b + 1) * L, :].astype(o1_ref.dtype)

        # ---- BN2 + ReLU epilogue (post-upsample BN, stats computed on h) ----
        # Nearest-2x duplication leaves per-channel batch mean / biased variance
        # unchanged, so the stats of h ARE the stats of the upsampled tensor.
        if fuse_up:
            m2 = jnp.sum(h, axis=0, keepdims=True) * inv_n
            e2 = jnp.sum(h * h, axis=0, keepdims=True) * inv_n
            v2 = jnp.maximum(e2 - m2 * m2, 0.0)
            sc2 = jax.lax.rsqrt(v2 + EPS) * g2_ref[...]
            sh2 = b2_ref[...] - m2 * sc2
            h2 = jnp.maximum(h * sc2 + sh2, 0.0)
            for b in range(B):
                o2_ref[b, :, :] = h2[b * L:(b + 1) * L, :].astype(o2_ref.dtype)

    return kernel


def _conv_bn_act(x_pad, w2d, bias, g1, b1, g2, b2, *, use_bn, fuse_up, ksize,
                 out1_dtype):
    """One conv layer of Up.
    x_pad: (B, L+K-1, Ci) bf16 with Ci % 128 == 0; w2d: (K*Ci, Cp) bf16;
    per-channel params: (1, Cp) f32.  Cp is a multiple of 128."""
    B, Lp, Ci = x_pad.shape
    L = Lp - (ksize - 1)
    Cp = w2d.shape[1]
    tn = 256 if Cp % 256 == 0 else LANE        # match 256-wide MXU on v6e/v7x
    assert Cp % tn == 0
    nt = Cp // tn

    kernel = _make_up_kernel(use_bn, fuse_up)

    vec_spec = pl.BlockSpec((1, tn), lambda j: (0, j))
    in_specs = [
        pl.BlockSpec((B, Lp, Ci), lambda j: (0, 0, 0)),     # full activation block
        pl.BlockSpec((ksize * Ci, tn), lambda j: (0, j)),   # channel tile of W
    ]
    inputs = [x_pad, w2d]
    if not use_bn:
        in_specs.append(vec_spec)
        inputs.append(bias)
    else:
        in_specs += [vec_spec, vec_spec]
        inputs += [g1, b1]
        if fuse_up:
            in_specs += [vec_spec, vec_spec]
            inputs += [g2, b2]

    out_spec = pl.BlockSpec((B, L, tn), lambda j: (0, 0, j))
    if fuse_up:
        out_shape = (jax.ShapeDtypeStruct((B, L, Cp), out1_dtype),
                     jax.ShapeDtypeStruct((B, L, Cp), jnp.float32))
        out_specs = (out_spec, out_spec)
    else:
        out_shape = jax.ShapeDtypeStruct((B, L, Cp), out1_dtype)
        out_specs = out_spec

    return pl.pallas_call(
        kernel,
        grid=(nt,),
        in_specs=in_specs,
        out_specs=out_specs,
        out_shape=out_shape,
        compiler_params=pltpu.CompilerParams(
            dimension_semantics=("parallel",),          # channel tiles independent
            vmem_limit_bytes=48 * 1024 * 1024,          # headroom under v7x 64 MiB
        ),
    )(*inputs)


# ----------------------------------------------------------------------------
# Up.forward (Pallas) — NCL in / NCL out, channel-last internally
# ----------------------------------------------------------------------------
def up_forward(params, x_ncl, *, use_bn=True, upscale=True):
    """x_ncl: (B, C_in, L) f32.  Returns (x, before_upscale) in NCL layout."""
    convs = params["convs"]
    bns = params.get("bns")
    up_bn = params.get("up_bn")

    c_out = convs[0]["w"].shape[0]
    K = convs[0]["w"].shape[2]
    pad = (K - 1) // 2
    cp = _round_up(c_out, LANE)

    def pad_vec(v):
        return jnp.pad(v, (0, cp - c_out)).reshape(1, cp).astype(jnp.float32)

    # Channel-last, in-channels padded to a lane multiple once at the boundary
    # (aligned tap-concat inside the kernel; padded channels stay zero).
    h = jnp.transpose(x_ncl, (0, 2, 1))                    # (B, L, Cin)
    cin0 = h.shape[-1]
    ci_p0 = _round_up(cin0, LANE)
    h = jnp.pad(h, ((0, 0), (0, 0), (0, ci_p0 - cin0))).astype(jnp.bfloat16)

    n_conv = len(convs)
    pre_up = None
    for i, cv in enumerate(convs):
        is_last = (i == n_conv - 1)
        fuse_up = bool(use_bn and upscale and is_last)
        ci = h.shape[-1]                                   # multiple of 128

        # weight: (Cout, Cin_i, K) -> (K, Cin_i, Cout) -> pad -> (K*Ci, Cp)
        w = jnp.transpose(cv["w"], (2, 1, 0))
        w = jnp.pad(w, ((0, 0),
                        (0, ci - w.shape[1]),              # pad in-channels (zeros)
                        (0, cp - c_out)))                  # pad out-channels
        w2d = w.reshape(K * ci, cp).astype(jnp.bfloat16)

        bias = pad_vec(cv["b"]) if not use_bn else None
        g1 = pad_vec(bns[i]["g"]) if use_bn else None
        b1 = pad_vec(bns[i]["bt"]) if use_bn else None
        g2 = pad_vec(up_bn["g"]) if fuse_up else None
        b2 = pad_vec(up_bn["bt"]) if fuse_up else None

        # halo rows only; h is already bf16 (previous layer emits bf16)
        x_pad = jnp.pad(h, ((0, 0), (pad, pad), (0, 0)))
        out1_dtype = jnp.float32 if is_last else jnp.bfloat16

        outs = _conv_bn_act(x_pad, w2d, bias, g1, b1, g2, b2,
                            use_bn=use_bn, fuse_up=fuse_up, ksize=K,
                            out1_dtype=out1_dtype)
        if fuse_up:
            h, pre_up = outs
        else:
            h = outs

    before = h                                             # (B, L, Cp) f32
    if upscale:
        src = pre_up if pre_up is not None else before     # BN2 already applied (or none)
        up = jnp.repeat(src[:, :, :c_out], 2, axis=1)      # nearest 2x on sliced channels
    else:
        up = before[:, :, :c_out]

    before_ncl = jnp.transpose(before[:, :, :c_out], (0, 2, 1)).astype(jnp.float32)
    up_ncl = jnp.transpose(up, (0, 2, 1)).astype(jnp.float32)
    return up_ncl, before_ncl


# ----------------------------------------------------------------------------
# Deterministic synthetic parameters (shapes follow Up.__init__)
# ----------------------------------------------------------------------------
def make_up_params(key, in_channels, out_channels, kernel_size=3, n_conv=1,
                   use_bn=True, upscale=True):
    holder = [key]

    def nxt():
        holder[0], sub = jax.random.split(holder[0])
        return sub

    convs, bns = [], []
    for i in range(n_conv):
        cin = in_channels if i == 0 else out_channels
        convs.append({
            "w": 0.1 * jax.random.normal(nxt(), (out_channels, cin, kernel_size),
                                         jnp.float32),
            "b": 0.1 * jax.random.normal(nxt(), (out_channels,), jnp.float32),
        })
        if use_bn:
            bns.append({
                "g": 1.0 + 0.1 * jax.random.normal(nxt(), (out_channels,), jnp.float32),
                "bt": 0.1 * jax.random.normal(nxt(), (out_channels,), jnp.float32),
            })
    params = {"convs": convs}
    if use_bn:
        params["bns"] = bns
        if upscale:
            params["up_bn"] = {
                "g": 1.0 + 0.1 * jax.random.normal(nxt(), (out_channels,), jnp.float32),
                "bt": 0.1 * jax.random.normal(nxt(), (out_channels,), jnp.float32),
            }
    return params


# ----------------------------------------------------------------------------
# Pure-JAX reference (mirrors the PyTorch forward in training mode).
# Operands (and the intermediate activation between conv layers) are rounded to
# bf16 exactly like the kernel path so the check stays tight.
# ----------------------------------------------------------------------------
def up_reference(params, x_ncl, *, use_bn=True, upscale=True):
    convs = params["convs"]
    bns = params.get("bns")
    up_bn = params.get("up_bn")
    K = convs[0]["w"].shape[2]
    pad = (K - 1) // 2
    n_conv = len(convs)

    x = jnp.transpose(x_ncl, (0, 2, 1)).astype(jnp.bfloat16).astype(jnp.float32)
    for i, cv in enumerate(convs):
        w = jnp.transpose(cv["w"], (2, 1, 0)).astype(jnp.bfloat16).astype(jnp.float32)
        L = x.shape[1]
        xp = jnp.pad(x, ((0, 0), (pad, pad), (0, 0)))
        y = sum(jnp.einsum("blc,cn->bln", xp[:, t:t + L, :], w[t]) for t in range(K))
        y = y + cv["b"]
        if use_bn:
            m = jnp.mean(y, axis=(0, 1), keepdims=True)
            v = jnp.mean((y - m) ** 2, axis=(0, 1), keepdims=True)
            y = (y - m) * jax.lax.rsqrt(v + EPS) * bns[i]["g"] + bns[i]["bt"]
        x = jnp.maximum(y, 0.0)
        if i < n_conv - 1:
            x = x.astype(jnp.bfloat16).astype(jnp.float32)   # bf16 intermediate chain
    before = x
    if upscale:
        u = jnp.repeat(before, 2, axis=1)
        if use_bn:
            m = jnp.mean(u, axis=(0, 1), keepdims=True)
            v = jnp.mean((u - m) ** 2, axis=(0, 1), keepdims=True)
            u = (u - m) * jax.lax.rsqrt(v + EPS) * up_bn["g"] + up_bn["bt"]
        u = jnp.maximum(u, 0.0)
    else:
        u = before
    return jnp.transpose(u, (0, 2, 1)), jnp.transpose(before, (0, 2, 1))


# ----------------------------------------------------------------------------
if __name__ == "__main__":
    B, C_IN, C_OUT, L, KSIZE = 2, 4, 8, 16, 3

    key = jax.random.PRNGKey(0)
    for n_conv in (1, 2):
        key, pkey, xkey = jax.random.split(key, 3)
        params = make_up_params(pkey, C_IN, C_OUT, kernel_size=KSIZE,
                                n_conv=n_conv, use_bn=True, upscale=True)
        x = jax.random.normal(xkey, (B, C_IN, L), jnp.float32)

        fwd = jax.jit(functools.partial(up_forward, params,
                                        use_bn=True, upscale=True))
        up_out, before_out = jax.block_until_ready(fwd(x))

        assert up_out.shape == (B, C_OUT, 2 * L), up_out.shape
        assert before_out.shape == (B, C_OUT, L), before_out.shape
        assert bool(jnp.all(jnp.isfinite(up_out)))
        assert bool(jnp.all(jnp.isfinite(before_out)))

        ref_up, ref_before = up_reference(params, x, use_bn=True, upscale=True)
        assert bool(jnp.allclose(before_out, ref_before, atol=2e-2, rtol=2e-2)), \
            float(jnp.max(jnp.abs(before_out - ref_before)))
        assert bool(jnp.allclose(up_out, ref_up, atol=2e-2, rtol=2e-2)), \
            float(jnp.max(jnp.abs(up_out - ref_up)))

    print("KERNEL_OK")
</pallas_src>

<mosaic_0001>
module attributes {stable_mosaic.version = 11 : i64} {
  func.func @kernel(%arg0: i32, %arg1: memref<2x18x128xbf16, #tpu.memory_space<vmem>>, %arg2: memref<384x128xbf16, #tpu.memory_space<vmem>>, %arg3: memref<1x128xf32, #tpu.memory_space<vmem>>, %arg4: memref<1x128xf32, #tpu.memory_space<vmem>>, %arg5: memref<1x128xf32, #tpu.memory_space<vmem>>, %arg6: memref<1x128xf32, #tpu.memory_space<vmem>>, %arg7: memref<2x16x128xf32, #tpu.memory_space<vmem>>, %arg8: memref<2x16x128xf32, #tpu.memory_space<vmem>>) attributes {dimension_semantics = [#tpu.dimension_semantics<parallel>], iteration_bounds = array<i64: 1>, scalar_prefetch = 0 : i64, scratch_operands = 0 : i64, tpu.core_type = #tpu.core_type<tc>, window_params = [{pipeline_mode = #tpu.pipeline_mode<synchronous>, transform_indices = @transform_0, window_bounds = array<i64: 2, 18, 128>}, {transform_indices = @transform_1, window_bounds = array<i64: 384, 128>}, {transform_indices = @transform_2, window_bounds = array<i64: 1, 128>}, {transform_indices = @transform_3, window_bounds = array<i64: 1, 128>}, {transform_indices = @transform_4, window_bounds = array<i64: 1, 128>}, {transform_indices = @transform_5, window_bounds = array<i64: 1, 128>}, {transform_indices = @transform_6, window_bounds = array<i64: 2, 16, 128>}, {transform_indices = @transform_7, window_bounds = array<i64: 2, 16, 128>}]} {
    %c0 = arith.constant 0 : index
    %c0_0 = arith.constant 0 : index
    %c0_1 = arith.constant 0 : index
    %0 = vector.load %arg1[%c0, %c0_0, %c0_1] : memref<2x18x128xbf16, #tpu.memory_space<vmem>>, vector<1x16x128xbf16>
    %1 = vector.shape_cast %0 : vector<1x16x128xbf16> to vector<16x128xbf16>
    %c0_2 = arith.constant 0 : index
    %c1 = arith.constant 1 : index
    %c0_3 = arith.constant 0 : index
    %2 = vector.load %arg1[%c0_2, %c1, %c0_3] : memref<2x18x128xbf16, #tpu.memory_space<vmem>>, vector<1x16x128xbf16>
    %3 = vector.shape_cast %2 : vector<1x16x128xbf16> to vector<16x128xbf16>
    %c0_4 = arith.constant 0 : index
    %c2 = arith.constant 2 : index
    %c0_5 = arith.constant 0 : index
    %4 = vector.load %arg1[%c0_4, %c2, %c0_5] : memref<2x18x128xbf16, #tpu.memory_space<vmem>>, vector<1x16x128xbf16>
    %5 = vector.shape_cast %4 : vector<1x16x128xbf16> to vector<16x128xbf16>
    %6 = tpu.concatenate %1, %3, %5 in 1 : vector<16x128xbf16>, vector<16x128xbf16>, vector<16x128xbf16> -> vector<16x384xbf16>
    %c1_6 = arith.constant 1 : index
    %c0_7 = arith.constant 0 : index
    %c0_8 = arith.constant 0 : index
    %7 = vector.load %arg1[%c1_6, %c0_7, %c0_8] : memref<2x18x128xbf16, #tpu.memory_space<vmem>>, vector<1x16x128xbf16>
    %8 = vector.shape_cast %7 : vector<1x16x128xbf16> to vector<16x128xbf16>
    %c1_9 = arith.constant 1 : index
    %c1_10 = arith.constant 1 : index
    %c0_11 = arith.constant 0 : index
    %9 = vector.load %arg1[%c1_9, %c1_10, %c0_11] : memref<2x18x128xbf16, #tpu.memory_space<vmem>>, vector<1x16x128xbf16>
    %10 = vector.shape_cast %9 : vector<1x16x128xbf16> to vector<16x128xbf16>
    %c1_12 = arith.constant 1 : index
    %c2_13 = arith.constant 2 : index
    %c0_14 = arith.constant 0 : index
    %11 = vector.load %arg1[%c1_12, %c2_13, %c0_14] : memref<2x18x128xbf16, #tpu.memory_space<vmem>>, vector<1x16x128xbf16>
    %12 = vector.shape_cast %11 : vector<1x16x128xbf16> to vector<16x128xbf16>
    %13 = tpu.concatenate %8, %10, %12 in 1 : vector<16x128xbf16>, vector<16x128xbf16>, vector<16x128xbf16> -> vector<16x384xbf16>
    %14 = tpu.concatenate %6, %13 in 0 : vector<16x384xbf16>, vector<16x384xbf16> -> vector<32x384xbf16>
    %c0_15 = arith.constant 0 : index
    %c0_16 = arith.constant 0 : index
    %15 = vector.load %arg2[%c0_15, %c0_16] : memref<384x128xbf16, #tpu.memory_space<vmem>>, vector<384x128xbf16>
    %cst = arith.constant dense<0.000000e+00> : vector<32x128xf32>
    %16 = tpu.matmul %14, %15, %cst {dimension_numbers = #tpu.dot_dimension_numbers<[1], [0], [0], [1], [0, 0, 1, 1], [], []>} : vector<32x384xbf16>, vector<384x128xbf16>, vector<32x128xf32> -> vector<32x128xf32>
    %cst_17 = arith.constant dense<0.000000e+00> : vector<128xf32>
    %17 = vector.multi_reduction <add>, %16, %cst_17 [0] : vector<32x128xf32> to vector<128xf32>
    %18 = vector.shape_cast %17 : vector<128xf32> to vector<1x128xf32>
    %cst_18 = arith.constant 3.125000e-02 : f32
    %19 = vector.broadcast %cst_18 : f32 to vector<1x128xf32>
    %20 = arith.mulf %18, %19 : vector<1x128xf32>
    %21 = arith.mulf %16, %16 : vector<32x128xf32>
    %cst_19 = arith.constant dense<0.000000e+00> : vector<128xf32>
    %22 = vector.multi_reduction <add>, %21, %cst_19 [0] : vector<32x128xf32> to vector<128xf32>
    %23 = vector.shape_cast %22 : vector<128xf32> to vector<1x128xf32>
    %cst_20 = arith.constant 3.125000e-02 : f32
    %24 = vector.broadcast %cst_20 : f32 to vector<1x128xf32>
    %25 = arith.mulf %23, %24 : vector<1x128xf32>
    %26 = arith.mulf %20, %20 : vector<1x128xf32>
    %27 = arith.subf %25, %26 : vector<1x128xf32>
    %cst_21 = arith.constant 0.000000e+00 : f32
    %28 = vector.broadcast %cst_21 : f32 to vector<1x128xf32>
    %29 = arith.maximumf %27, %28 : vector<1x128xf32>
    %cst_22 = arith.constant 9.99999974E-6 : f32
    %30 = vector.broadcast %cst_22 : f32 to vector<1x128xf32>
    %31 = arith.addf %29, %30 : vector<1x128xf32>
    %32 = math.rsqrt %31 : vector<1x128xf32>
    %c0_23 = arith.constant 0 : index
    %c0_24 = arith.constant 0 : index
    %33 = vector.load %arg3[%c0_23, %c0_24] : memref<1x128xf32, #tpu.memory_space<vmem>>, vector<1x128xf32>
    %34 = arith.mulf %32, %33 : vector<1x128xf32>
    %c0_25 = arith.constant 0 : index
    %c0_26 = arith.constant 0 : index
    %35 = vector.load %arg4[%c0_25, %c0_26] : memref<1x128xf32, #tpu.memory_space<vmem>>, vector<1x128xf32>
    %36 = arith.mulf %20, %34 : vector<1x128xf32>
    %37 = arith.subf %35, %36 : vector<1x128xf32>
    %38 = vector.broadcast %34 : vector<1x128xf32> to vector<32x128xf32>
    %39 = arith.mulf %16, %38 : vector<32x128xf32>
    %40 = vector.broadcast %37 : vector<1x128xf32> to vector<32x128xf32>
    %41 = arith.addf %39, %40 : vector<32x128xf32>
    %cst_27 = arith.constant 0.000000e+00 : f32
    %42 = vector.broadcast %cst_27 : f32 to vector<32x128xf32>
    %43 = arith.maximumf %41, %42 : vector<32x128xf32>
    %44 = vector.extract_strided_slice %43 {offsets = [0, 0], sizes = [16, 128], strides = [1, 1]} : vector<32x128xf32> to vector<16x128xf32>
    %c0_28 = arith.constant 0 : index
    %c0_29 = arith.constant 0 : index
    %c0_30 = arith.constant 0 : index
    %45 = vector.load %arg7[%c0_28, %c0_29, %c0_30] : memref<2x16x128xf32, #tpu.memory_space<vmem>>, vector<1x16x128xf32>
    %46 = vector.shape_cast %45 : vector<1x16x128xf32> to vector<16x128xf32>
    %47 = vector.shape_cast %44 : vector<16x128xf32> to vector<1x16x128xf32>
    tpu.vector_store %arg7[%c0_28, %c0_29, %c0_30], %47 {strides = array<i32>} : memref<2x16x128xf32, #tpu.memory_space<vmem>>, vector<1x16x128xf32>,
    %48 = vector.extract_strided_slice %43 {offsets = [16, 0], sizes = [16, 128], strides = [1, 1]} : vector<32x128xf32> to vector<16x128xf32>
    %c1_31 = arith.constant 1 : index
    %c0_32 = arith.constant 0 : index
    %c0_33 = arith.constant 0 : index
    %49 = vector.load %arg7[%c1_31, %c0_32, %c0_33] : memref<2x16x128xf32, #tpu.memory_space<vmem>>, vector<1x16x128xf32>
    %50 = vector.shape_cast %49 : vector<1x16x128xf32> to vector<16x128xf32>
    %51 = vector.shape_cast %48 : vector<16x128xf32> to vector<1x16x128xf32>
    tpu.vector_store %arg7[%c1_31, %c0_32, %c0_33], %51 {strides = array<i32>} : memref<2x16x128xf32, #tpu.memory_space<vmem>>, vector<1x16x128xf32>,
    %cst_34 = arith.constant dense<0.000000e+00> : vector<128xf32>
    %52 = vector.multi_reduction <add>, %43, %cst_34 [0] : vector<32x128xf32> to vector<128xf32>
    %53 = vector.shape_cast %52 : vector<128xf32> to vector<1x128xf32>
    %cst_35 = arith.constant 3.125000e-02 : f32
    %54 = vector.broadcast %cst_35 : f32 to vector<1x128xf32>
    %55 = arith.mulf %53, %54 : vector<1x128xf32>
    %56 = arith.mulf %43, %43 : vector<32x128xf32>
    %cst_36 = arith.constant dense<0.000000e+00> : vector<128xf32>
    %57 = vector.multi_reduction <add>, %56, %cst_36 [0] : vector<32x128xf32> to vector<128xf32>
    %58 = vector.shape_cast %57 : vector<128xf32> to vector<1x128xf32>
    %cst_37 = arith.constant 3.125000e-02 : f32
    %59 = vector.broadcast %cst_37 : f32 to vector<1x128xf32>
    %60 = arith.mulf %58, %59 : vector<1x128xf32>
    %61 = arith.mulf %55, %55 : vector<1x128xf32>
    %62 = arith.subf %60, %61 : vector<1x128xf32>
    %cst_38 = arith.constant 0.000000e+00 : f32
    %63 = vector.broadcast %cst_38 : f32 to vector<1x128xf32>
    %64 = arith.maximumf %62, %63 : vector<1x128xf32>
    %cst_39 = arith.constant 9.99999974E-6 : f32
    %65 = vector.broadcast %cst_39 : f32 to vector<1x128xf32>
    %66 = arith.addf %64, %65 : vector<1x128xf32>
    %67 = math.rsqrt %66 : vector<1x128xf32>
    %c0_40 = arith.constant 0 : index
    %c0_41 = arith.constant 0 : index
    %68 = vector.load %arg5[%c0_40, %c0_41] : memref<1x128xf32, #tpu.memory_space<vmem>>, vector<1x128xf32>
    %69 = arith.mulf %67, %68 : vector<1x128xf32>
    %c0_42 = arith.constant 0 : index
    %c0_43 = arith.constant 0 : index
    %70 = vector.load %arg6[%c0_42, %c0_43] : memref<1x128xf32, #tpu.memory_space<vmem>>, vector<1x128xf32>
    %71 = arith.mulf %55, %69 : vector<1x128xf32>
    %72 = arith.subf %70, %71 : vector<1x128xf32>
    %73 = vector.broadcast %69 : vector<1x128xf32> to vector<32x128xf32>
    %74 = arith.mulf %43, %73 : vector<32x128xf32>
    %75 = vector.broadcast %72 : vector<1x128xf32> to vector<32x128xf32>
    %76 = arith.addf %74, %75 : vector<32x128xf32>
    %cst_44 = arith.constant 0.000000e+00 : f32
    %77 = vector.broadcast %cst_44 : f32 to vector<32x128xf32>
    %78 = arith.maximumf %76, %77 : vector<32x128xf32>
    %79 = vector.extract_strided_slice %78 {offsets = [0, 0], sizes = [16, 128], strides = [1, 1]} : vector<32x128xf32> to vector<16x128xf32>
    %c0_45 = arith.constant 0 : index
    %c0_46 = arith.constant 0 : index
    %c0_47 = arith.constant 0 : index
    %80 = vector.load %arg8[%c0_45, %c0_46, %c0_47] : memref<2x16x128xf32, #tpu.memory_space<vmem>>, vector<1x16x128xf32>
    %81 = vector.shape_cast %80 : vector<1x16x128xf32> to vector<16x128xf32>
    %82 = vector.shape_cast %79 : vector<16x128xf32> to vector<1x16x128xf32>
    tpu.vector_store %arg8[%c0_45, %c0_46, %c0_47], %82 {strides = array<i32>} : memref<2x16x128xf32, #tpu.memory_space<vmem>>, vector<1x16x128xf32>,
    %83 = vector.extract_strided_slice %78 {offsets = [16, 0], sizes = [16, 128], strides = [1, 1]} : vector<32x128xf32> to vector<16x128xf32>
    %c1_48 = arith.constant 1 : index
    %c0_49 = arith.constant 0 : index
    %c0_50 = arith.constant 0 : index
    %84 = vector.load %arg8[%c1_48, %c0_49, %c0_50] : memref<2x16x128xf32, #tpu.memory_space<vmem>>, vector<1x16x128xf32>
    %85 = vector.shape_cast %84 : vector<1x16x128xf32> to vector<16x128xf32>
    %86 = vector.shape_cast %83 : vector<16x128xf32> to vector<1x16x128xf32>
    tpu.vector_store %arg8[%c1_48, %c0_49, %c0_50], %86 {strides = array<i32>} : memref<2x16x128xf32, #tpu.memory_space<vmem>>, vector<1x16x128xf32>,
    return
  }
  func.func @transform_0(%arg0: i32) -> (i32, i32, i32) {
    %c0_i32 = arith.constant 0 : i32
    %c0_i32_0 = arith.constant 0 : i32
    %c0_i32_1 = arith.constant 0 : i32
    %c0_i32_2 = arith.constant 0 : i32
    return %c0_i32, %c0_i32_0, %c0_i32_1 : i32, i32, i32
  }
  func.func @transform_1(%arg0: i32) -> (i32, i32) {
    %c0_i32 = arith.constant 0 : i32
    %c0_i32_0 = arith.constant 0 : i32
    return %c0_i32, %arg0 : i32, i32
  }
  func.func @transform_2(%arg0: i32) -> (i32, i32) {
    %c0_i32 = arith.constant 0 : i32
    %c0_i32_0 = arith.constant 0 : i32
    return %c0_i32, %arg0 : i32, i32
  }
  func.func @transform_3(%arg0: i32) -> (i32, i32) {
    %c0_i32 = arith.constant 0 : i32
    %c0_i32_0 = arith.constant 0 : i32
    return %c0_i32, %arg0 : i32, i32
  }
  func.func @transform_4(%arg0: i32) -> (i32, i32) {
    %c0_i32 = arith.constant 0 : i32
    %c0_i32_0 = arith.constant 0 : i32
    return %c0_i32, %arg0 : i32, i32
  }
  func.func @transform_5(%arg0: i32) -> (i32, i32) {
    %c0_i32 = arith.constant 0 : i32
    %c0_i32_0 = arith.constant 0 : i32
    return %c0_i32, %arg0 : i32, i32
  }
  func.func @transform_6(%arg0: i32) -> (i32, i32, i32) {
    %c0_i32 = arith.constant 0 : i32
    %c0_i32_0 = arith.constant 0 : i32
    %c0_i32_1 = arith.constant 0 : i32
    return %c0_i32, %c0_i32_0, %arg0 : i32, i32, i32
  }
  func.func @transform_7(%arg0: i32) -> (i32, i32, i32) {
    %c0_i32 = arith.constant 0 : i32
    %c0_i32_0 = arith.constant 0 : i32
    %c0_i32_1 = arith.constant 0 : i32
    return %c0_i32, %c0_i32_0, %arg0 : i32, i32, i32
  }
}

</mosaic_0001>

<bundles_post_ra>
// kernel: up_forward.1
= control target key start
LH: loop header
LB: loop body
LE: loop exit
PB: predicated region body
PF: predicated region fallthrough
CT: control target
= control target key end

     0   :  { %13 = vsyncpa [#allocation3], 0  ;;  %s685_s24 = smov [#allocation2]   ;;  %s801_s0 = inlined_call_operand.vmem [shape: bf16[2,18,128], index: 0, kind: input, shape index: {}]   ;;  %s802_s1 = inlined_call_operand.hbm [shape: bf16[384,128], index: 1, kind: input, shape index: {}]   ;;  %s803_s2 = inlined_call_operand.vmem [shape: f32[1,128], index: 2, kind: input, shape index: {}]   ;;  %s804_s3 = inlined_call_operand.vmem [shape: f32[1,128], index: 3, kind: input, shape index: {}]   ;;  %s805_s4 = inlined_call_operand.vmem [shape: f32[1,128], index: 4, kind: input, shape index: {}]   ;;  %s806_s5 = inlined_call_operand.vmem [shape: f32[1,128], index: 5, kind: input, shape index: {}]   ;;  %s807_s6 = inlined_call_operand.vmem [shape: f32[2,16,128], index: 6, kind: output, shape index: {0}]   ;;  %s808_s7 = inlined_call_operand.vmem [shape: f32[2,16,128], index: 7, kind: output, shape index: {1}]  }
   0x1   :  { %s21_s25 = sshll.u32 %s685_s24, 4  ;;  %s22_s25 = int_to_ptr.vmem [resolvable:$true] %s21_s25 }
   0x2   :  { %s671_s26 = scalar_lea.vmem %s22_s25, 3072  ;;  %p676_p1 = scmp.lt.s32.totalorder %s22_s25, %s22_s25 }
   0x3   :  { %p672_p0 = scmp.ne.s32.totalorder %s22_s25, %s671_s26  ;;  %p677_p2 = scmp.lt.s32.totalorder %s671_s26, %s671_s26 }
   0x5   :  { %p678_p3 = por %p677_p2, %p676_p1 }
   0x7   :  { %p679_p4 = pnand %p678_p3, %p672_p0 }
   0x9   :  { %682 = shalt.err (!%p679_p4)
}
   0xa   :  { %s686_s27 = smov 64   ;;  %s687_s28 = smov 4  }
   0xb   :  { %27 = dma.hbm_to_vmem [thread:$0]  %s802_s1, 3072, %s22_s25, [#allocation3], %s686_s27, %s686_s27, %s687_s28  }
   0xc   :  { %683 = dma.done.wait [#allocation3], 3072  }
   0xd   :  { %684 = vsyncadd [#allocation3], 4294964224  ;;  %v629_v0 = vld [vmem:[#allocation2 + $0x78] sm:$0xff]   ;;  %v632_v3 = vld [vmem:[#allocation2 + $0x70] sm:$0xff]   ;;  %vm70_vm0 = vcmask 1046528  }
   0xe   :  { %v630_v1 = vld [vmem:[#allocation2 + $0xb8] sm:$0xff]   ;;  %568 = vmatprep.subr.bf16.mxu0 %v629_v0  ;;  %v633_v4 = vld [vmem:[#allocation2 + $0xb0] sm:$0xff]   ;;  %v635_v6 = vld [vmem:[#allocation2 + $0x68] sm:$0xff]   ;;  %vm53_vm1 = vsmask.f32 7424 }
   0xf   :  { %v631_v2 = vld [vmem:[#allocation2 + $0x38] sm:$0xff]   ;;  %606 = vmatprep.subr.bf16.mxu1 %v630_v1  ;;  %v634_v5 = vld [vmem:[#allocation2 + $0x30] sm:$0xff]   ;;  %v636_v7 = vld [vmem:[#allocation2 + $0xa8] sm:$0xff]  }
  0x10   :  { %569 = vmatpush3.bf16.msra.mxu0 %v631_v2  ;;  %607 = vmatpush3.bf16.msra.mxu1 %v630_v1  ;;  %v637_v8 = vld [vmem:[#allocation2 + $0x28] sm:$0xff]   ;;  %v638_v9 = vld [vmem:[#allocation2 + $0x60] sm:$0xff]   ;;  %v641_v12 = vld [vmem:[#allocation2 + $0x58] sm:$0xff]  }
  0x11   :  { %570 = vmatprep.subr.bf16.mxu0 %v632_v3  ;;  %608 = vmatprep.subr.bf16.mxu1 %v633_v4  ;;  %v639_v10 = vld [vmem:[#allocation2 + $0xa0] sm:$0xff]   ;;  %v642_v13 = vld [vmem:[#allocation2 + $0x98] sm:$0xff]   ;;  %v644_v15 = vld [vmem:[#allocation2 + $0x50] sm:$0xff]  }
  0x12   :  { %v640_v11 = vld [vmem:[#allocation2 + $0x20] sm:$0xff]   ;;  %v643_v14 = vld [vmem:[#allocation2 + $0x18] sm:$0xff]   ;;  %v645_v16 = vld [vmem:[#allocation2 + $0x90] sm:$0xff]  }
  0x13   :  { %v646_v17 = vld [vmem:[#allocation2 + $0x10] sm:$0xff]   ;;  %v647_v18 = vld [vmem:[#allocation2 + $0x48] sm:$0xff]   ;;  %v650_v21 = vld [vmem:[#allocation2 + $0x40] sm:$0xff]  }
  0x14   :  { %571 = vmatpush3.bf16.msra.mxu0 %v634_v5  ;;  %609 = vmatpush3.bf16.msra.mxu1 %v633_v4  ;;  %v648_v19 = vld [vmem:[#allocation2 + $0x88] sm:$0xff]   ;;  %v40_v22 = vld [vmem:[%s801_s0] sm:$0xf]  ;;  %v41_v23 = vld [vmem:[%s801_s0 + $0x4] sm:$0xf] }
  0x15   :  { %572 = vmatprep.subr.bf16.mxu0 %v635_v6  ;;  %610 = vmatprep.subr.bf16.mxu1 %v636_v7  ;;  %v649_v20 = vld [vmem:[#allocation2 + $0x8] sm:$0xff]   ;;  %v651_v24 = vld [vmem:[#allocation2 + $0x80] sm:$0xff]   ;;  %v530_v25 = vcombine.low %v40_v22, %v41_v23  ;;  %v534_v30 = vld [vmem:[%s801_s0 + $0x10] sm:$0xf] }
  0x16   :  { %v654_v26 = vld [vmem:[%s801_s0 + $0x8] ss:$0 sps:$4 sm:$0x11]   ;;  %v43_v27 = vld [vmem:[%s801_s0] sm:$0xe] }
  0x17   :  { %v532_v28 = vcombine.low %v43_v27, %v41_v23  ;;  %v533_v29 = vld [vmem:[%s801_s0 + $0xc] sm:$0xf]  ;;  %v55_v31 = vshrl.u32 %v530_v25, 16  ;;  %v57_v32 = vshll.u32 %v530_v25, 16  ;;  %v62_v33 = vshll.u32 %v654_v26, 16  ;;  %v652_v36 = vld [vmem:[#allocation2] sm:$0xff]  }
  0x18   :  { %573 = vmatpush3.bf16.msra.mxu0 %v637_v8  ;;  %611 = vmatpush3.bf16.msra.mxu1 %v636_v7  ;;  %v72_v34 = vrot.slane %v654_v26, 1  ;;  %v536_v35 = vld [vmem:[%s801_s0 + $0xc] sm:$0xe]  ;;  %v537_v38 = vcombine.low %v533_v29, %v534_v30  ;;  %v657_v39 = vld [vmem:[%s801_s0 + $0x14] ss:$0 sps:$4 sm:$0x11]  }
  0x19   :  { %574 = vmatprep.subr.bf16.mxu0 %v638_v9  ;;  %612 = vmatprep.subr.bf16.mxu1 %v639_v10  ;;  %v71_v37 = vrot.slane %v532_v28, 1  ;;  %v539_v40 = vcombine.low %v536_v35, %v534_v30  ;;  %v59_v41 = vrot.slane %v57_v32, 1  ;;  %v64_v42 = vrot.slane %v62_v33, 1 }
  0x1a   :  { %v106_v45 = vrot.slane %v657_v39, 1  ;;  %v90_v47 = vshrl.u32 %v537_v38, 16  ;;  %v92_v48 = vshll.u32 %v537_v38, 16  ;;  %v97_v49 = vshll.u32 %v657_v39, 16 }
  0x1b   :  { %v73_v43 = vsel %vm70_vm0, %v71_v37, %v72_v34  ;;  %v105_v44 = vrot.slane %v539_v40, 1  ;;  %v60_v46 = vor.u32 %v59_v41, %v55_v31  ;;  %v433_v40 = vlaneseq }
  0x1c   :  { %575 = vmatpush3.bf16.msra.mxu0 %v640_v11  ;;  %613 = vmatpush3.bf16.msra.mxu1 %v639_v10  ;;  %v94_v52 = vrot.slane %v92_v48, 1  ;;  %v99_v53 = vrot.slane %v97_v49, 1 }
  0x1d   :  { %576 = vmatprep.subr.bf16.mxu0 %v641_v12  ;;  %614 = vmatprep.subr.bf16.mxu1 %v642_v13  ;;  %v107_v50 = vsel %vm70_vm0, %v105_v44, %v106_v45  ;;  %v65_v51 = vsel %vm53_vm1, %v60_v46, %v64_v42  ;;  %v434_v41 = vshrl.u32 %v433_v40, 7  ;;  %v428_v42 = vld [vmem:[%s803_s2] sm:$0x1] }
  0x1e   :  { %622 = vmatprep.mubr.bf16.mxu1 %v73_v43  ;;  %333 = vmatprep.mubr.bf16.mxu0 %v65_v51  ;;  %v95_v54 = vor.u32 %v94_v52, %v90_v47  ;;  %v430_v46 = vld [vmem:[%s804_s3] sm:$0x1] }
  0x1f   :  { %v762_v43 = vsub.s32 0, %v434_v41 }
  0x20   :  { %577 = vmatpush3.bf16.msra.mxu0 %v643_v14  ;;  %615 = vmatpush3.bf16.msra.mxu1 %v642_v13  ;;  %v100_v55 = vsel %vm53_vm1, %v95_v54, %v99_v53 }
  0x21   :  { %578 = vmatprep.subr.bf16.mxu0 %v644_v15  ;;  %616 = vmatprep.subr.bf16.mxu1 %v645_v16 }
  0x24   :  { %579 = vmatpush3.bf16.msra.mxu0 %v646_v17  ;;  %617 = vmatpush3.bf16.msra.mxu1 %v645_v16 }
  0x25   :  { %580 = vmatprep.subr.bf16.mxu0 %v647_v18  ;;  %618 = vmatprep.subr.bf16.mxu1 %v648_v19 }
  0x28   :  { %581 = vmatpush3.bf16.msra.mxu0 %v649_v20  ;;  %619 = vmatpush3.bf16.msra.mxu1 %v648_v19 }
  0x29   :  { %582 = vmatprep.subr.bf16.mxu0 %v650_v21  ;;  %620 = vmatprep.subr.bf16.mxu1 %v651_v24 }
  0x2c   :  { %583 = vmatpush3.bf16.msra.mxu0 %v652_v36  ;;  %621 = vmatpush3.bf16.msra.mxu1 %v651_v24 }
  0x2f   :  { %334 = vmatmul.mubr.bf16.vlgmr.msra.gmra.mxu0 %v530_v25  ;;  %623 = vmatmul.mubr.bf16.vlgmr.msra.gmra.mxu1 %v107_v50 }
  0x30   :  { %341 = vmatprep.mubr.bf16.mxu0 %v100_v55 }
  0x37   :  { %342 = vmatmul.mubr.bf16.gmra.mxu0 %v537_v38 }
  0xef   :  { %v584_v56 = vpop.f32.mrf.mxu0  ;;  %v624_v57 = vpop.f32.mrf.mxu1 }
  0xf1   :  { %v585_v58 = vpop.f32.mrf.mxu0  ;;  %v384_v59 = vpop.f32.mrf.mxu1 }
  0xf2   :  { %v586_v63 = vadd.f32 %v585_v58, %v584_v56 }
  0xf3   :  { %v587_v60 = vpop.f32.mrf.mxu0  ;;  %v625_v61 = vpop.f32.mrf.mxu1 }
  0xf4   :  { %v385_v5 = vadd.f32 %v586_v63, %v384_v59 }
  0xf5   :  { %v588_v62 = vpop.f32.mrf.mxu0  ;;  %v387_v1 = vpop.f32.mrf.mxu1 }
  0xf6   :  { %v589_v0 = vadd.f32 %v588_v62, %v587_v60  ;;  %v409_v11 = vmul.f32 %v385_v5, %v385_v5 }
  0xf7   :  { %v590_v2 = vpop.f32.mrf.mxu0 }
  0xf8   :  { %v388_v3 = vadd.f32 %v589_v0, %v387_v1 }
  0xf9   :  { %v591_v4 = vpop.f32.mrf.mxu0 }
  0xfa   :  { %v592_v6 = vadd.f32 %v591_v4, %v590_v2  ;;  %v410_v8 = vmul.f32 %v388_v3, %v388_v3  ;;  %v399_v12 = vadd.f32 %v388_v3, %v385_v5 }
  0xfb   :  { %v593_v7 = vpop.f32.mrf.mxu0 }
  0xfc   :  { %v393_v9 = vadd.f32 %v624_v57, %v592_v6  ;;  %v413_v15 = vadd.f32 %v410_v8, %v409_v11 }
  0xfd   :  { %v594_v10 = vpop.f32.mrf.mxu0 }
  0xfe   :  { %v411_v13 = vmul.f32 %v393_v9, %v393_v9  ;;  %v595_v14 = vadd.f32 %v594_v10, %v593_v7  ;;  %v400_v16 = vadd.f32 %v399_v12, %v393_v9 }
 0x100   :  { %v396_v17 = vadd.f32 %v625_v61, %v595_v14  ;;  %v414_v18 = vadd.f32 %v413_v15, %v411_v13 }
 0x102   :  { %v401_v19 = vadd.f32 %v400_v16, %v396_v17  ;;  %v412_v20 = vmul.f32 %v396_v17, %v396_v17 }
 0x104   :  { %v402_v21 = vrot.slane %v401_v19, 4  ;;  %v415_v22 = vadd.f32 %v414_v18, %v412_v20 }
 0x106   :  { %v403_v23 = vadd.f32 %v402_v21, %v401_v19  ;;  %v416_v24 = vrot.slane %v415_v22, 4 }
 0x108   :  { %v404_v25 = vrot.slane %v403_v23, 2  ;;  %v417_v26 = vadd.f32 %v416_v24, %v415_v22 }
 0x10a   :  { %v405_v27 = vadd.f32 %v404_v25, %v403_v23  ;;  %v418_v28 = vrot.slane %v417_v26, 2 }
 0x10c   :  { %v406_v29 = vrot.slane %v405_v27, 1  ;;  %v419_v30 = vadd.f32 %v418_v28, %v417_v26 }
 0x10e   :  { %v407_v31 = vadd.f32 %v406_v29, %v405_v27  ;;  %v420_v32 = vrot.slane %v419_v30, 1  ;;  %v489_v27 = vld [vmem:[%s805_s4] sm:$0x1] }
 0x110   :  { %v408_v33 = vmul.f32 0.03125, %v407_v31  ;;  %v421_v34 = vadd.f32 %v420_v32, %v419_v30  ;;  %v491_v30 = vld [vmem:[%s806_s5] sm:$0x1] }
 0x112   :  { %v422_v35 = vmul.f32 0.03125, %v421_v34  ;;  %v423_v36 = vmul.f32 %v408_v33, %v408_v33 }
 0x114   :  { %v424_v37 = vsub.f32 %v422_v35, %v423_v36 }
 0x116   :  { %v425_v38 = vmax.f32 %v424_v37, 0.0 }
 0x118   :  { %v426_v39 = vadd.f32 1e-05, %v425_v38 }
 0x11a   :  { %659 = vrsqrt.f32 %v426_v39 }
 0x127   :  { %v660_v44 = vpop.eup %659 }
 0x128   :  { %v429_v45 = vmul.f32 %v660_v44, %v428_v42 }
 0x12a   :  { %v431_v47 = vmul.f32 %v429_v45, %v408_v33  ;;  %v436_v48 = vrot.slane %v429_v45, %v762_v43 }
 0x12c   :  { %v432_v49 = vsub.f32 %v430_v46, %v431_v47  ;;  %v437_v50 = vmul.f32 %v436_v48, %v385_v5  ;;  %v438_v51 = vmul.f32 %v436_v48, %v388_v3  ;;  %v439_v52 = vmul.f32 %v436_v48, %v393_v9 }
 0x12d   :  { %v440_v53 = vmul.f32 %v436_v48, %v396_v17 }
 0x12e   :  { %v445_v54 = vrot.slane %v432_v49, %v762_v43 }
 0x130   :  { %v447_v55 = vadd.f32 %v445_v54, %v437_v50  ;;  %v448_v56 = vadd.f32 %v445_v54, %v438_v51  ;;  %v449_v57 = vadd.f32 %v445_v54, %v439_v52  ;;  %v450_v58 = vadd.f32 %v445_v54, %v440_v53 }
 0x132   :  { %v451_v59 = vmax.f32 %v447_v55, 0.0  ;;  %v452_v60 = vmax.f32 %v448_v56, 0.0  ;;  %v453_v61 = vmax.f32 %v449_v57, 0.0  ;;  %v454_v62 = vmax.f32 %v450_v58, 0.0 }
 0x134   :  { %455 = vst [vmem:[%s807_s6] sm:$0xff] %v451_v59  ;;  %456 = vst [vmem:[%s807_s6 + $0x8] sm:$0xff] %v452_v60  ;;  %v460_v63 = vadd.f32 %v452_v60, %v451_v59  ;;  %v470_v0 = vmul.f32 %v451_v59, %v451_v59  ;;  %v471_v1 = vmul.f32 %v452_v60, %v452_v60 }
 0x135   :  { %564 = vst [vmem:[%s807_s6 + $0x10] sm:$0xff] %v453_v61  ;;  %565 = vst [vmem:[%s807_s6 + $0x18] sm:$0xff] %v454_v62  ;;  %v472_v3 = vmul.f32 %v453_v61, %v453_v61  ;;  %v473_v6 = vmul.f32 %v454_v62, %v454_v62 }
 0x136   :  { %v461_v2 = vadd.f32 %v460_v63, %v453_v61  ;;  %v474_v4 = vadd.f32 %v471_v1, %v470_v0 }
 0x138   :  { %v462_v5 = vadd.f32 %v461_v2, %v454_v62  ;;  %v475_v7 = vadd.f32 %v474_v4, %v472_v3 }
 0x13a   :  { %v463_v8 = vrot.slane %v462_v5, 4  ;;  %v476_v9 = vadd.f32 %v475_v7, %v473_v6 }
 0x13c   :  { %v464_v10 = vadd.f32 %v463_v8, %v462_v5  ;;  %v477_v11 = vrot.slane %v476_v9, 4 }
 0x13e   :  { %v465_v12 = vrot.slane %v464_v10, 2  ;;  %v478_v13 = vadd.f32 %v477_v11, %v476_v9 }
 0x140   :  { %v466_v14 = vadd.f32 %v465_v12, %v464_v10  ;;  %v479_v15 = vrot.slane %v478_v13, 2 }
 0x142   :  { %v467_v16 = vrot.slane %v466_v14, 1  ;;  %v480_v17 = vadd.f32 %v479_v15, %v478_v13 }
 0x144   :  { %v468_v18 = vadd.f32 %v467_v16, %v466_v14  ;;  %v481_v19 = vrot.slane %v480_v17, 1 }
 0x146   :  { %v469_v20 = vmul.f32 0.03125, %v468_v18  ;;  %v482_v21 = vadd.f32 %v481_v19, %v480_v17 }
 0x148   :  { %v483_v22 = vmul.f32 0.03125, %v482_v21  ;;  %v484_v23 = vmul.f32 %v469_v20, %v469_v20 }
 0x14a   :  { %v485_v24 = vsub.f32 %v483_v22, %v484_v23 }
 0x14c   :  { %v486_v25 = vmax.f32 %v485_v24, 0.0 }
 0x14e   :  { %v487_v26 = vadd.f32 1e-05, %v486_v25 }
 0x150   :  { %661 = vrsqrt.f32 %v487_v26 }
 0x15d   :  { %v662_v28 = vpop.eup %661 }
 0x15e   :  { %v490_v29 = vmul.f32 %v662_v28, %v489_v27 }
 0x160   :  { %v492_v31 = vmul.f32 %v490_v29, %v469_v20  ;;  %v497_v32 = vrot.slane %v490_v29, %v762_v43 }
 0x162   :  { %v493_v33 = vsub.f32 %v491_v30, %v492_v31  ;;  %v498_v34 = vmul.f32 %v497_v32, %v451_v59  ;;  %v499_v35 = vmul.f32 %v497_v32, %v452_v60  ;;  %v500_v36 = vmul.f32 %v497_v32, %v453_v61 }
 0x163   :  { %v501_v37 = vmul.f32 %v497_v32, %v454_v62 }
 0x164   :  { %v506_v38 = vrot.slane %v493_v33, %v762_v43 }
 0x166   :  { %v508_v39 = vadd.f32 %v506_v38, %v498_v34  ;;  %v509_v40 = vadd.f32 %v506_v38, %v499_v35  ;;  %v510_v41 = vadd.f32 %v506_v38, %v500_v36  ;;  %v511_v42 = vadd.f32 %v506_v38, %v501_v37 }
 0x168   :  { %v512_v44 = vmax.f32 %v508_v39, 0.0  ;;  %v513_v45 = vmax.f32 %v509_v40, 0.0  ;;  %v514_v46 = vmax.f32 %v510_v41, 0.0  ;;  %v515_v47 = vmax.f32 %v511_v42, 0.0 }
 0x16a   :  { %516 = vst [vmem:[%s808_s7] sm:$0xff] %v512_v44  ;;  %517 = vst [vmem:[%s808_s7 + $0x8] sm:$0xff] %v513_v45 }
 0x16b   :  { %566 = vst [vmem:[%s808_s7 + $0x10] sm:$0xff] %v514_v46  ;;  %567 = vst [vmem:[%s808_s7 + $0x18] sm:$0xff] %v515_v47 }
 0x16c   :  { %529 = vsyncpa [#allocation3], 1 }

</bundles_post_ra>
